<compile_context>
chip_gen: v7x
topology: tpu7x:2x2x1
jax: 0.10.0
libtpu: 0.0.40
codegen_flags: <defaults>
</compile_context>

<pallas_src>
import numpy as np
import jax
import jax.numpy as jnp
from jax.experimental import pallas as pl
from jax.experimental.pallas import tpu as pltpu

# Model hyper-parameters (configs.*)
SEQ_LEN = 16        # configs.seq_len
PRED_LEN = 8        # configs.pred_len
CHANNELS = 4        # configs.enc_in
MOVING_AVG = 5      # configs.moving_avg (odd; paper default is 25)


def _round_up(x: int, m: int) -> int:
    return (x + m - 1) // m * m


def _moving_average_matrix(seq_len: int, kernel_size: int) -> np.ndarray:
    """(L, L) matrix A with trend = A @ x reproducing series_decomp's
    edge-replicated AvgPool1d(kernel_size, stride=1)."""
    pad = (kernel_size - 1) // 2
    idx = np.clip(
        np.arange(seq_len)[:, None] + np.arange(kernel_size)[None, :] - pad,
        0, seq_len - 1)                                   # (L, K) source idx
    return np.eye(seq_len, dtype=np.float32)[idx].sum(axis=1) / kernel_size


def fold_dlinear_params(w_seasonal, b_seasonal, w_trend, b_trend,
                        seq_len=SEQ_LEN, moving_avg=MOVING_AVG):
    """Fold series_decomp + both Linears + biases into ONE (P, L+1) weight.

    out = W_s @ (x - A x) + b_s + W_t @ (A x) + b_t
        = (W_s (I - A) + W_t A) @ x + (b_s + b_t)
    The bias is appended as an extra weight column; the kernel appends a
    matching ones-row to x, so the whole forward is a single matmul.
    """
    assert moving_avg % 2 == 1, \
        "series_decomp edge replication assumes an odd moving_avg kernel"
    A = jnp.asarray(_moving_average_matrix(seq_len, moving_avg))      # (L, L)
    I = jnp.eye(seq_len, dtype=jnp.float32)
    w_eff = w_seasonal @ (I - A) + w_trend @ A                        # (P, L)
    b_eff = (b_seasonal + b_trend).reshape(-1, 1)                     # (P, 1)
    return jnp.concatenate([w_eff, b_eff], axis=1)                    # (P, L+1)


def _dlinear_kernel(x_ref, w_ref, out_ref):
    # x_ref: (L+1, N_TILE)   w_ref: (P, L+1)   out_ref: (P, N_TILE)
    # One MXU push per tile, lane-dense unmasked stores, bias pre-folded.
    out_ref[...] = jnp.dot(w_ref[...], x_ref[...],
                           preferred_element_type=jnp.float32
                           ).astype(out_ref.dtype)


def dlinear_forward(x_enc, w_aug, *, n_tile_max=512):
    """x_enc: (B, L, C) -> (B, pred_len, C)."""
    B, L, C = x_enc.shape
    P, Lp1 = w_aug.shape
    assert Lp1 == L + 1
    N = B * C

    # Lane-dense layout: (B, L, C) -> (L, B*C); append ones-row (folded bias).
    x_t = jnp.transpose(x_enc, (1, 0, 2)).reshape(L, N)
    x_aug = jnp.concatenate([x_t, jnp.ones((1, N), x_t.dtype)], axis=0)

    # Lane tile: multiple of 128 (>=256 saturates a v6e/v7x MXU pass); pad N.
    n_tile = min(n_tile_max, _round_up(N, 128))
    n_pad = _round_up(N, n_tile)
    if n_pad != N:
        x_aug = jnp.pad(x_aug, ((0, 0), (0, n_pad - N)))
    grid = (n_pad // n_tile,)

    itemsize = jnp.dtype(x_enc.dtype).itemsize
    flops = 2 * P * Lp1 * n_pad
    bytes_accessed = (Lp1 * n_pad + P * Lp1 + P * n_pad) * itemsize
    # W resident + double-buffered x/out tiles, with generous headroom.
    vmem_bytes = max(4 * 1024 * 1024,
                     8 * (Lp1 * n_tile + P * n_tile) * 4 + 4 * P * Lp1 * 4)

    y = pl.pallas_call(
        _dlinear_kernel,
        out_shape=jax.ShapeDtypeStruct((P, n_pad), x_enc.dtype),
        grid=grid,
        in_specs=[
            pl.BlockSpec((Lp1, n_tile), lambda j: (0, j)),   # stream x tiles
            pl.BlockSpec((P, Lp1), lambda j: (0, 0)),        # W stays resident
        ],
        out_specs=pl.BlockSpec((P, n_tile), lambda j: (0, j)),
        compiler_params=pltpu.CompilerParams(
            dimension_semantics=("parallel",),    # both TCs on v7x
            vmem_limit_bytes=int(vmem_bytes),
        ),
        cost_estimate=pl.CostEstimate(flops=flops, transcendentals=0,
                                      bytes_accessed=bytes_accessed),
    )(x_aug, w_aug)

    # (P, B*C) -> (B, P, C)
    return y[:, :N].reshape(P, B, C).transpose(1, 0, 2)


def _reference(x_enc, w_seasonal, b_seasonal, w_trend, b_trend):
    """Pure-JAX reference mirroring the PyTorch forward (forecast task)."""
    pad = (MOVING_AVG - 1) // 2
    front = jnp.repeat(x_enc[:, :1, :], pad, axis=1)
    end = jnp.repeat(x_enc[:, -1:, :], pad, axis=1)
    xpad = jnp.concatenate([front, x_enc, end], axis=1)          # (B, Lp, C)
    trend = jnp.stack(
        [xpad[:, j:j + SEQ_LEN, :] for j in range(MOVING_AVG)], axis=0
    ).mean(axis=0)                                               # (B, L, C)
    seasonal = x_enc - trend
    s_i = jnp.transpose(seasonal, (0, 2, 1))                     # (B, C, L)
    t_i = jnp.transpose(trend, (0, 2, 1))
    s_out = jnp.einsum('bcl,pl->bcp', s_i, w_seasonal) + b_seasonal
    t_out = jnp.einsum('bcl,pl->bcp', t_i, w_trend) + b_trend
    return jnp.transpose(s_out + t_out, (0, 2, 1))               # (B, P, C)


if __name__ == "__main__":
    key = jax.random.PRNGKey(0)
    k_x, k_ws, k_wt, k_bs, k_bt = jax.random.split(key, 5)

    B = 2
    x_enc = jax.random.normal(k_x, (B, SEQ_LEN, CHANNELS), dtype=jnp.float32)

    # Module init: weights = 1/seq_len * ones, biases = nn.Linear default.
    # Small perturbation makes seasonal/trend paths differ so the folding is
    # actually exercised by the numeric check.
    w_seasonal = (jnp.full((PRED_LEN, SEQ_LEN), 1.0 / SEQ_LEN, jnp.float32)
                  + 0.05 * jax.random.normal(k_ws, (PRED_LEN, SEQ_LEN),
                                             jnp.float32))
    w_trend = (jnp.full((PRED_LEN, SEQ_LEN), 1.0 / SEQ_LEN, jnp.float32)
               + 0.05 * jax.random.normal(k_wt, (PRED_LEN, SEQ_LEN),
                                          jnp.float32))
    bound = 1.0 / (SEQ_LEN ** 0.5)
    b_seasonal = jax.random.uniform(k_bs, (PRED_LEN,), jnp.float32,
                                    -bound, bound)
    b_trend = jax.random.uniform(k_bt, (PRED_LEN,), jnp.float32,
                                 -bound, bound)

    # One-time parameter folding (decomposition + 2 Linears + bias -> 1 GEMM).
    w_aug = fold_dlinear_params(w_seasonal, b_seasonal, w_trend, b_trend)

    out = jax.jit(dlinear_forward)(x_enc, w_aug)
    out = jax.block_until_ready(out)

    ref = _reference(x_enc, w_seasonal, b_seasonal, w_trend, b_trend)
    assert out.shape == (B, PRED_LEN, CHANNELS)
    assert jnp.allclose(out, ref, atol=1e-4, rtol=1e-4)

    print("KERNEL_OK")
</pallas_src>

<mosaic_0001>
module attributes {stable_mosaic.version = 11 : i64} {
  func.func @_dlinear_kernel(%arg0: i32, %arg1: memref<17x128xf32, #tpu.memory_space<vmem>>, %arg2: memref<8x17xf32, #tpu.memory_space<vmem>>, %arg3: memref<8x128xf32, #tpu.memory_space<vmem>>) attributes {dimension_semantics = [#tpu.dimension_semantics<parallel>], iteration_bounds = array<i64: 1>, scalar_prefetch = 0 : i64, scratch_operands = 0 : i64, tpu.core_type = #tpu.core_type<tc>, window_params = [{transform_indices = @transform_0, window_bounds = array<i64: 17, 128>}, {pipeline_mode = #tpu.pipeline_mode<synchronous>, transform_indices = @transform_1, window_bounds = array<i64: 8, 17>}, {transform_indices = @transform_2, window_bounds = array<i64: 8, 128>}]} {
    %c0 = arith.constant 0 : index
    %c0_0 = arith.constant 0 : index
    %0 = vector.load %arg2[%c0, %c0_0] : memref<8x17xf32, #tpu.memory_space<vmem>>, vector<8x17xf32>
    %c0_1 = arith.constant 0 : index
    %c0_2 = arith.constant 0 : index
    %1 = vector.load %arg1[%c0_1, %c0_2] : memref<17x128xf32, #tpu.memory_space<vmem>>, vector<17x128xf32>
    %cst = arith.constant dense<0.000000e+00> : vector<8x128xf32>
    %2 = tpu.matmul %0, %1, %cst {dimension_numbers = #tpu.dot_dimension_numbers<[1], [0], [0], [1], [0, 0, 1, 1], [], []>} : vector<8x17xf32>, vector<17x128xf32>, vector<8x128xf32> -> vector<8x128xf32>
    %c0_3 = arith.constant 0 : index
    %c0_4 = arith.constant 0 : index
    %3 = vector.load %arg3[%c0_3, %c0_4] : memref<8x128xf32, #tpu.memory_space<vmem>>, vector<8x128xf32>
    tpu.vector_store %arg3[%c0_3, %c0_4], %2 {strides = array<i32>} : memref<8x128xf32, #tpu.memory_space<vmem>>, vector<8x128xf32>,
    return
  }
  func.func @transform_0(%arg0: i32) -> (i32, i32) {
    %c0_i32 = arith.constant 0 : i32
    %c0_i32_0 = arith.constant 0 : i32
    return %c0_i32, %arg0 : i32, i32
  }
  func.func @transform_1(%arg0: i32) -> (i32, i32) {
    %c0_i32 = arith.constant 0 : i32
    %c0_i32_0 = arith.constant 0 : i32
    %c0_i32_1 = arith.constant 0 : i32
    return %c0_i32, %c0_i32_0 : i32, i32
  }
  func.func @transform_2(%arg0: i32) -> (i32, i32) {
    %c0_i32 = arith.constant 0 : i32
    %c0_i32_0 = arith.constant 0 : i32
    return %c0_i32, %arg0 : i32, i32
  }
}

</mosaic_0001>

<bundles_post_ra>
// kernel: dlinear_forward.1
= control target key start
LH: loop header
LB: loop body
LE: loop exit
PB: predicated region body
PF: predicated region fallthrough
CT: control target
= control target key end

     0   :  { %v119_v0 = vmov 0.0|0.0   ;;  %vm120_vm0 = vmmov 0   ;;  %v121_v3 = vmov 0.0   ;;  %vm19_vm1 = vcmask 1040384   ;;  %s152_s0 = inlined_call_operand.vmem [shape: f32[17,128], index: 0, kind: input, shape index: {}]   ;;  %s153_s1 = inlined_call_operand.vmem [shape: f32[8,17], index: 1, kind: input, shape index: {}]   ;;  %s154_s2 = inlined_call_operand.vmem [shape: f32[8,128], index: 2, kind: output, shape index: {}]  }
   0x1   :  { %113 = vmatprep.subr.bf16.mxu0 %v119_v0  ;;  %v12_v1 = vld [vmem:[%s152_s0] sm:$0xff]  ;;  %v13_v2 = vld [vmem:[%s152_s0 + $0x8] sm:$0xff]  ;;  %110 = vmatprep.mubr.msk.f32.mxu0 %vm120_vm0, %v121_v3  ;;  %v14_v5 = vld [vmem:[%s152_s0 + $0x10] sm:$0x1]  ;;  %vm15_vm2 = vcmask 138240  }
   0x2   :  { %v114_v4 = vpack.c.bf16 %v13_v2, %v12_v1  ;;  %v11_v6 = vld [vmem:[%s153_s1] sm:$0xff] }
   0x4   :  { %115 = vmatpush3.bf16.msra.mxu0 %v114_v4 }
   0x5   :  { %108 = vmatprep.subr.mxu0 %v121_v3 }
   0x8   :  { %109 = vmatpush3.msk.msra.mxu0 %vm19_vm1, %v14_v5 }
   0x9   :  { %111 = vmatmul.mubr.msk.f32.vlgmr.msra.gmra.mrb[0].mxu0 %vm15_vm2, %v11_v6 }
  0xdc   :  { %v89_v7 = vpop.f32.mrb[0].mxu0 }
  0xdd   :  { %93 = vst [vmem:[%s154_s2] sm:$0xff] %v89_v7  ;;  %v112_v8 = vpop.f32.mrb[1].mxu0 }

</bundles_post_ra>
